<compile_context>
chip_gen: v7x
topology: tpu7x:2x2x1
jax: 0.10.0
libtpu: 0.0.40
codegen_flags: <defaults>
</compile_context>

<pallas_src>
import functools

import jax
import jax.numpy as jnp
from jax.experimental import pallas as pl
from jax.experimental.pallas import tpu as pltpu


def _feature_projector_kernel(x_ref, gamma_ref, beta_ref, w_ref, b_ref, o_ref, *, eps):
    # x_ref:     (TM, Din)   rows = a tile of the flattened batch*seq axis
    # gamma_ref: (1, Din)
    # beta_ref:  (1, Din)
    # w_ref:     (Din, TN)
    # b_ref:     (1, TN)
    # o_ref:     (TM, TN)
    x = x_ref[...].astype(jnp.float32)

    # One-pass LayerNorm statistics (biased variance, eps inside rsqrt) — matches
    # nn.LayerNorm(input_dim).  var = E[x^2] - mean^2, clamped at 0 for safety.
    inv_d = 1.0 / x.shape[-1]
    mean = jnp.sum(x, axis=-1, keepdims=True) * inv_d
    mean_sq = jnp.sum(x * x, axis=-1, keepdims=True) * inv_d
    var = jnp.maximum(mean_sq - mean * mean, 0.0)
    inv = jax.lax.rsqrt(var + eps)

    normed = (x - mean) * inv
    normed = normed * gamma_ref[...].astype(jnp.float32) + beta_ref[...].astype(jnp.float32)

    # Linear projection: feed the MXU in the weight's native dtype (bf16 stays bf16),
    # accumulate in f32.
    normed = normed.astype(w_ref.dtype)
    proj = jnp.dot(normed, w_ref[...], preferred_element_type=jnp.float32)
    proj = proj + b_ref[...].astype(jnp.float32)

    # Dropout(p=0.0) is the identity.
    # TODO(synk): non-zero dropout would need pltpu.prng_seed/prng_random_bits masking.
    o_ref[...] = proj.astype(o_ref.dtype)


def _round_up(x, m):
    return ((x + m - 1) // m) * m


def _vmem_budget_bytes():
    """Generation-aware usable-VMEM budget: ~75% of physical capacity
    (v5e/v6e 128 MiB -> ~96 MiB, v7x 64 MiB -> 48 MiB), conservative fallback 48 MiB."""
    cap = 64 * 1024 * 1024
    try:
        cap = int(pltpu.get_tpu_info().vmem_capacity_bytes)
    except Exception:  # query unavailable (e.g. CPU tracing) -> conservative default
        pass
    return max(32 * 1024 * 1024, (cap * 3) // 4)


def _choose_tiles(m, din, dout_p, in_itemsize, w_itemsize, out_itemsize, budget):
    """Pick (TM, TN, est_bytes).

    TN: full dout_p if the (double-buffer-counted) weight fits in ~1/3 of the budget,
        else the largest 128-multiple that does (the rest streams over a Dout grid axis).
    TM: largest sublane-packed row tile whose pipelined working set fits next to the
        weight tile; clamped to <=1024 and so the row axis has >=2 grid steps when M
        allows (keeps both v7x TensorCores busy; harmless on single-TC v5e/v6e).
    """
    lane = 128
    din_l = _round_up(din, lane)             # lane-padded VMEM footprint of the feature dim
    pack = max(8, 32 // in_itemsize)         # sublane packing: f32=8, bf16=16, int8=32

    # --- TN: weight residency vs. streaming ---
    w_col_bytes = 2 * din * w_itemsize       # per output column, incl. 2 pipeline buffers
    tn_cap = max(lane, ((budget // 3) // max(w_col_bytes, 1)) // lane * lane)
    tn = min(dout_p, tn_cap)

    # --- TM: fit pipelined x/out tiles + f32 temporaries beside the weight tile ---
    fixed = 2 * din * tn * w_itemsize                              # weight tile (x2 bufs)
    fixed += 2 * (2 * din_l * in_itemsize + tn * out_itemsize)     # gamma/beta/bias
    per_row = (2 * din_l * in_itemsize        # x tile, double-buffered
               + 2 * tn * out_itemsize        # out tile, double-buffered
               + 2 * din_l * 4 + tn * 4)      # f32 LN temporaries + f32 accumulator
    tm = max(pack, (max(budget - fixed, 0) // max(per_row, 1)) // pack * pack)
    tm = min(tm, 1024)
    tm = min(tm, _round_up(m, pack))
    if m >= 2 * pack:                         # guarantee >=2 row steps for megacore
        tm = min(tm, _round_up(pl.cdiv(m, 2), pack))

    est = fixed + tm * per_row                # estimated scoped-VMEM working set
    return tm, tn, est


def feature_projector(hidden_states, gamma, beta, weight, bias, *, eps=1e-5,
                      allow_bf16_matmul=False):
    """hidden_states: (..., Din); weight: (Din, Dout); bias: (Dout,). Returns (..., Dout)."""
    *lead, Din = hidden_states.shape
    Dout = weight.shape[1]
    M = 1
    for d in lead:
        M *= d
    dtype = hidden_states.dtype

    # Optional one-time weight cast: bf16 matmul runs at full MXU rate and halves the
    # resident-weight VMEM; off by default to preserve f32 numerics.
    if allow_bf16_matmul and weight.dtype == jnp.float32:
        weight = weight.astype(jnp.bfloat16)

    # Pad the output feature dim (weight/bias only — cheap, done once) to a multiple of
    # 128 for lane-dense stores; sliced off after the call only if actually padded.
    Dout_p = _round_up(Dout, 128)
    w_p = weight if Dout_p == Dout else jnp.pad(weight, ((0, 0), (0, Dout_p - Dout)))
    b_p = bias if Dout_p == Dout else jnp.pad(bias, ((0, Dout_p - Dout),))

    budget = _vmem_budget_bytes()
    TM, TN, est = _choose_tiles(
        M, Din, Dout_p,
        jnp.dtype(dtype).itemsize, jnp.dtype(w_p.dtype).itemsize,
        jnp.dtype(dtype).itemsize, budget)

    x2d = hidden_states.reshape(M, Din)       # merges leading dims only (no copy)
    gamma2d = gamma.reshape(1, Din)
    beta2d = beta.reshape(1, Din)
    bias2d = b_p.reshape(1, Dout_p)

    # No row padding: pl.cdiv grid + Pallas edge-block masking handle M % TM != 0.
    grid = (pl.cdiv(M, TM), pl.cdiv(Dout_p, TN))
    kernel = functools.partial(_feature_projector_kernel, eps=eps)

    out2d = pl.pallas_call(
        kernel,
        out_shape=jax.ShapeDtypeStruct((M, Dout_p), dtype),
        grid_spec=pltpu.PrefetchScalarGridSpec(
            num_scalar_prefetch=0,
            grid=grid,
            in_specs=[
                pl.BlockSpec((TM, Din), lambda i, j: (i, 0)),    # row tile (pipelined)
                pl.BlockSpec((1, Din), lambda i, j: (0, 0)),     # gamma (resident)
                pl.BlockSpec((1, Din), lambda i, j: (0, 0)),     # beta  (resident)
                pl.BlockSpec((Din, TN), lambda i, j: (0, j)),    # weight tile
                pl.BlockSpec((1, TN), lambda i, j: (0, j)),      # bias tile
            ],
            out_specs=pl.BlockSpec((TM, TN), lambda i, j: (i, j)),
        ),
        compiler_params=pltpu.CompilerParams(
            # Both axes are independent: the row axis shards across v7x's two TCs; the
            # Dout axis only has >1 step when the weight is too big to stay resident.
            dimension_semantics=("parallel", "parallel"),
            # Generation-aware scoped-VMEM limit derived from the estimated working set
            # (never above ~75% of physical VMEM for the current generation).
            vmem_limit_bytes=int(min(budget, max(2 * est, 32 * 1024 * 1024))),
        ),
    )(x2d, gamma2d, beta2d, w_p, bias2d)

    if Dout_p != Dout:
        out2d = out2d[:, :Dout]
    return out2d.reshape(*lead, Dout)


def _reference(hidden_states, gamma, beta, weight, bias, eps=1e-5):
    x = hidden_states.astype(jnp.float32)
    g = gamma.astype(jnp.float32)
    bt = beta.astype(jnp.float32)
    w = weight.astype(jnp.float32)
    b = bias.astype(jnp.float32)
    mean = jnp.mean(x, axis=-1, keepdims=True)
    var = jnp.mean((x - mean) ** 2, axis=-1, keepdims=True)
    normed = (x - mean) * jax.lax.rsqrt(var + eps) * g + bt
    return normed @ w + b


if __name__ == "__main__":
    key = jax.random.PRNGKey(0)

    def _init(k, B, S, Din, Dout, dtype):
        kx, kg, kb, kw, kb2 = jax.random.split(k, 5)
        x = jax.random.normal(kx, (B, S, Din), dtype=jnp.float32)
        gamma = 1.0 + 0.1 * jax.random.normal(kg, (Din,), dtype=jnp.float32)
        beta = 0.1 * jax.random.normal(kb, (Din,), dtype=jnp.float32)
        bound = 1.0 / (Din ** 0.5)
        w = jax.random.uniform(kw, (Din, Dout), minval=-bound, maxval=bound,
                               dtype=jnp.float32)
        b = jax.random.uniform(kb2, (Dout,), minval=-bound, maxval=bound,
                               dtype=jnp.float32)
        return tuple(a.astype(dtype) for a in (x, gamma, beta, w, b))

    cases = [
        # (B, S, Din, Dout, dtype, tol)
        (2, 8, 32, 64, jnp.float32, 1e-4),    # M=16 -> 2 row tiles; Dout padded to 128
        (3, 7, 48, 72, jnp.float32, 1e-4),    # M=21 -> partial edge row block; Dout%128!=0
        (2, 16, 64, 96, jnp.bfloat16, 5e-2),  # bf16 MXU path; 16-row sublane packing
    ]
    for (B, S, Din, Dout, dtype, tol) in cases:
        key, sub = jax.random.split(key)
        x, g, bt, w, b = _init(sub, B, S, Din, Dout, dtype)
        out = feature_projector(x, g, bt, w, b, eps=1e-5)
        out = jax.block_until_ready(out)
        ref = _reference(x, g, bt, w, b, eps=1e-5)
        assert out.shape == (B, S, Dout)
        assert jnp.allclose(out.astype(jnp.float32), ref, atol=tol, rtol=tol), (
            f"mismatch for case {(B, S, Din, Dout, str(dtype))}")

    print("KERNEL_OK")
</pallas_src>

<mosaic_0001>
module attributes {stable_mosaic.version = 11 : i64} {
  func.func @_feature_projector_kernel(%arg0: i32, %arg1: i32, %arg2: memref<8x32xf32, #tpu.memory_space<vmem>>, %arg3: memref<1x32xf32, #tpu.memory_space<vmem>>, %arg4: memref<1x32xf32, #tpu.memory_space<vmem>>, %arg5: memref<32x128xf32, #tpu.memory_space<vmem>>, %arg6: memref<1x128xf32, #tpu.memory_space<vmem>>, %arg7: memref<8x128xf32, #tpu.memory_space<vmem>>) attributes {dimension_semantics = [#tpu.dimension_semantics<parallel>, #tpu.dimension_semantics<parallel>], iteration_bounds = array<i64: 2, 1>, scalar_prefetch = 0 : i64, scratch_operands = 0 : i64, tpu.core_type = #tpu.core_type<tc>, window_params = [{transform_indices = @transform_0, window_bounds = array<i64: 8, 32>}, {pipeline_mode = #tpu.pipeline_mode<synchronous>, transform_indices = @transform_1, window_bounds = array<i64: 1, 32>}, {pipeline_mode = #tpu.pipeline_mode<synchronous>, transform_indices = @transform_2, window_bounds = array<i64: 1, 32>}, {transform_indices = @transform_3, window_bounds = array<i64: 32, 128>}, {transform_indices = @transform_4, window_bounds = array<i64: 1, 128>}, {transform_indices = @transform_5, window_bounds = array<i64: 8, 128>}]} {
    %c0 = arith.constant 0 : index
    %c0_0 = arith.constant 0 : index
    %0 = vector.load %arg2[%c0, %c0_0] : memref<8x32xf32, #tpu.memory_space<vmem>>, vector<8x32xf32>
    %cst = arith.constant dense<0.000000e+00> : vector<8xf32>
    %1 = vector.multi_reduction <add>, %0, %cst [1] : vector<8x32xf32> to vector<8xf32>
    %2 = vector.shape_cast %1 : vector<8xf32> to vector<8x1xf32>
    %cst_1 = arith.constant 3.125000e-02 : f32
    %3 = vector.broadcast %cst_1 : f32 to vector<8x1xf32>
    %4 = arith.mulf %2, %3 : vector<8x1xf32>
    %5 = arith.mulf %0, %0 : vector<8x32xf32>
    %cst_2 = arith.constant dense<0.000000e+00> : vector<8xf32>
    %6 = vector.multi_reduction <add>, %5, %cst_2 [1] : vector<8x32xf32> to vector<8xf32>
    %7 = vector.shape_cast %6 : vector<8xf32> to vector<8x1xf32>
    %cst_3 = arith.constant 3.125000e-02 : f32
    %8 = vector.broadcast %cst_3 : f32 to vector<8x1xf32>
    %9 = arith.mulf %7, %8 : vector<8x1xf32>
    %10 = arith.mulf %4, %4 : vector<8x1xf32>
    %11 = arith.subf %9, %10 : vector<8x1xf32>
    %cst_4 = arith.constant 0.000000e+00 : f32
    %12 = vector.broadcast %cst_4 : f32 to vector<8x1xf32>
    %13 = arith.maximumf %11, %12 : vector<8x1xf32>
    %cst_5 = arith.constant 9.99999974E-6 : f32
    %14 = vector.broadcast %cst_5 : f32 to vector<8x1xf32>
    %15 = arith.addf %13, %14 : vector<8x1xf32>
    %16 = math.rsqrt %15 : vector<8x1xf32>
    %17 = vector.broadcast %4 : vector<8x1xf32> to vector<8x32xf32>
    %18 = arith.subf %0, %17 : vector<8x32xf32>
    %19 = vector.broadcast %16 : vector<8x1xf32> to vector<8x32xf32>
    %20 = arith.mulf %18, %19 : vector<8x32xf32>
    %c0_6 = arith.constant 0 : index
    %c0_7 = arith.constant 0 : index
    %21 = vector.load %arg3[%c0_6, %c0_7] : memref<1x32xf32, #tpu.memory_space<vmem>>, vector<1x32xf32>
    %22 = vector.broadcast %21 : vector<1x32xf32> to vector<8x32xf32>
    %23 = arith.mulf %20, %22 : vector<8x32xf32>
    %c0_8 = arith.constant 0 : index
    %c0_9 = arith.constant 0 : index
    %24 = vector.load %arg4[%c0_8, %c0_9] : memref<1x32xf32, #tpu.memory_space<vmem>>, vector<1x32xf32>
    %25 = vector.broadcast %24 : vector<1x32xf32> to vector<8x32xf32>
    %26 = arith.addf %23, %25 : vector<8x32xf32>
    %c0_10 = arith.constant 0 : index
    %c0_11 = arith.constant 0 : index
    %27 = vector.load %arg5[%c0_10, %c0_11] : memref<32x128xf32, #tpu.memory_space<vmem>>, vector<32x128xf32>
    %cst_12 = arith.constant dense<0.000000e+00> : vector<8x128xf32>
    %28 = tpu.matmul %26, %27, %cst_12 {dimension_numbers = #tpu.dot_dimension_numbers<[1], [0], [0], [1], [0, 0, 1, 1], [], []>} : vector<8x32xf32>, vector<32x128xf32>, vector<8x128xf32> -> vector<8x128xf32>
    %c0_13 = arith.constant 0 : index
    %c0_14 = arith.constant 0 : index
    %29 = vector.load %arg6[%c0_13, %c0_14] : memref<1x128xf32, #tpu.memory_space<vmem>>, vector<1x128xf32>
    %30 = vector.broadcast %29 : vector<1x128xf32> to vector<8x128xf32>
    %31 = arith.addf %28, %30 : vector<8x128xf32>
    %c0_15 = arith.constant 0 : index
    %c0_16 = arith.constant 0 : index
    %32 = vector.load %arg7[%c0_15, %c0_16] : memref<8x128xf32, #tpu.memory_space<vmem>>, vector<8x128xf32>
    tpu.vector_store %arg7[%c0_15, %c0_16], %31 {strides = array<i32>} : memref<8x128xf32, #tpu.memory_space<vmem>>, vector<8x128xf32>,
    return
  }
  func.func @transform_0(%arg0: i32, %arg1: i32) -> (i32, i32) {
    %c0_i32 = arith.constant 0 : i32
    %c0_i32_0 = arith.constant 0 : i32
    return %arg0, %c0_i32 : i32, i32
  }
  func.func @transform_1(%arg0: i32, %arg1: i32) -> (i32, i32) {
    %c0_i32 = arith.constant 0 : i32
    %c0_i32_0 = arith.constant 0 : i32
    %c0_i32_1 = arith.constant 0 : i32
    return %c0_i32, %c0_i32_0 : i32, i32
  }
  func.func @transform_2(%arg0: i32, %arg1: i32) -> (i32, i32) {
    %c0_i32 = arith.constant 0 : i32
    %c0_i32_0 = arith.constant 0 : i32
    %c0_i32_1 = arith.constant 0 : i32
    return %c0_i32, %c0_i32_0 : i32, i32
  }
  func.func @transform_3(%arg0: i32, %arg1: i32) -> (i32, i32) {
    %c0_i32 = arith.constant 0 : i32
    %c0_i32_0 = arith.constant 0 : i32
    return %c0_i32, %arg1 : i32, i32
  }
  func.func @transform_4(%arg0: i32, %arg1: i32) -> (i32, i32) {
    %c0_i32 = arith.constant 0 : i32
    %c0_i32_0 = arith.constant 0 : i32
    return %c0_i32, %arg1 : i32, i32
  }
  func.func @transform_5(%arg0: i32, %arg1: i32) -> (i32, i32) {
    %c0_i32 = arith.constant 0 : i32
    return %arg0, %arg1 : i32, i32
  }
}

</mosaic_0001>

<bundles_post_ra>
// kernel: tpu_custom_call.1
= control target key start
LH: loop header
LB: loop body
LE: loop exit
PB: predicated region body
PF: predicated region fallthrough
CT: control target
= control target key end

     0   :  { %10 = vsyncpa [#allocation3], 0  ;;  %s1063_s0 = inlined_call_operand.hbm [shape: f32[16,32], index: 0, kind: input, shape index: {}]   ;;  %s1064_s1 = inlined_call_operand.vmem [shape: f32[1,32], index: 1, kind: input, shape index: {}]   ;;  %s1065_s2 = inlined_call_operand.vmem [shape: f32[1,32], index: 2, kind: input, shape index: {}]   ;;  %s1066_s3 = inlined_call_operand.hbm [shape: f32[32,128], index: 3, kind: input, shape index: {}]   ;;  %s1067_s4 = inlined_call_operand.vmem [shape: f32[1,128], index: 4, kind: input, shape index: {}]   ;;  %s1068_s5 = inlined_call_operand.hbm [shape: f32[16,128], index: 5, kind: output, shape index: {}]  }
   0x1   :  { %12 = vsyncpa [#allocation3 + $0x1], 0 }
   0x2   :  { %13 = vsyncpa [#allocation6], 0 }
   0x3   :  { %14 = vsyncpa [#allocation4], 0 }
   0x4   :  { %16 = vsyncpa [#allocation4 + $0x1], 0  ;;  %s833_s18 = smov 0   ;;  %s835_s19 = smov 0  }
   0x5   :  { %s837_s20 = smov 0   ;;  %s839_s21 = smov 0  }
   0x6   :  { %s841_s22 = smov 0   ;;  %s843_s23 = smov 0  }
   0x7 LB: > { %s527_s24 = sadd.s32 4294967295, %s793_s23   ;;  %s528_s25 = sadd.s32 4294967294, %s793_s23   ;;  %s793_s23 = sphi %s843_s23, %s22_s23   ;;  %s789_s22 = sphi %s841_s22, %s1092_s22   ;;  %s785_s21 = sphi %s839_s21, %s1091_s21   ;;  %s781_s20 = sphi %s837_s20, %s1090_s20   ;;  %s777_s19 = sphi %s835_s19, %s1089_s19   ;;  %s773_s18 = sphi %s833_s18, %s1088_s18  }
   0x8   : > { %p54_p0 = scmp.ne.s32.totalorder %s777_s19, %s773_s18  ;;  %p867_p1 = scmp.eq.s32.totalorder %s527_s24, 0 }
   0x9   : > { %p871_p2 = scmp.eq.s32.totalorder %s527_s24, 1  ;;  %p180_p3 = scmp.eq.s32.totalorder %s528_s25, 1 }
   0xa   : > { %s1073_s26 = scalar_select %p867_p1, 1, 0 }
   0xb   : > { %s1074_s27 = scalar_select %p871_p2, 1, 0 }
   0xc   : > { %p877_p4 = por %p867_p1, %p54_p0  ;;  %p529_p5 = scmp.ge.s32.totalorder %s793_s23, 1 }
   0xd   : > { %p882_p6 = por %p180_p3, %p54_p0  ;;  %p187_p7 = scmp.lt.s32.totalorder %s793_s23, 3 }
   0xe   : > { %s1075_s28 = scalar_select %p877_p4, 1, 0 }
   0xf   : > { %s1076_s29 = scalar_select %p882_p6, 1, 0 }
  0x10   : > { %p887_p8 = pnand %p529_p5, %p187_p7  ;;  %s795_s6 = smov [#allocation5]  }
  0x11   : > { %s207_s7 = sshll.u32 %s795_s6, 4  ;;  %s34_s9 = sadd.s32 1, %s789_s22  ;;  %s208_s7 = int_to_ptr.vmem [resolvable:$true] %s207_s7 }
  0x12   : > { %s1077_s30 = scalar_select %p887_p8, 1, 0 }
  0x13   : > { %p577_p9 = pneg %p887_p8  ;;  %s649_s12 = scalar_lea.hbm %s1066_s3, 512 }
  0x14   : > { %p650_p12 = scmp.ne.s32.totalorder %s1066_s3, %s649_s12  ;;  %p656_p5 = scmp.lt.u32.totalorder %s649_s12, %s1066_s3 }
  0x15   : > { %p896_p11 = pnand %p577_p9, %p867_p1 }
  0x17   : > { %p651_p13 = pneg %p896_p11 }
  0x19   : > { %p652_p0 = pnand %p651_p13, %p650_p12 }
  0x1b   : > { %p653_p3 = pneg %p652_p0 }
  0x1d   : > { %p658_p7 = pnand %p656_p5, %p653_p3 }
  0x1f   : > { %661 = shalt.err (!%p658_p7)
}
  0x20   : > { %s662_s17 = scalar_lea.vmem %s208_s7, 512  ;;  %p670_p1 = scmp.lt.s32.totalorder %s208_s7, %s208_s7 }
  0x21   : > { %p663_p9 = scmp.ne.s32.totalorder %s208_s7, %s662_s17  ;;  %p671_p4 = scmp.lt.s32.totalorder %s662_s17, %s662_s17 }
  0x23   : > { %p665_p10 = pnand %p663_p9, %p651_p13  ;;  %p672_p8 = por %p671_p4, %p670_p1 }
  0x25   : > { %p666_p6 = pneg %p665_p10 }
  0x27   : > { %p673_p2 = pnand %p672_p8, %p666_p6 }
  0x29   : > { %676 = shalt.err (!%p673_p2)
}
  0x2a   : > { %s796_s24 = smov 128   ;;  %s797_s25 = smov 8  }
  0x2b   : > { %580 = dma.hbm_to_vmem [thread:$0]  (!%p896_p11), %s1066_s3, 512, %s208_s7, [#allocation6], %s796_s24, %s796_s24, %s797_s25  }
  0x2c   : > { %p36_p1 = scmp.ge.s32.totalorder %s34_s9, 2  ;;  %s41_s11 = sadd.s32 1, %s781_s20 }
  0x2d   : > { %p48_p2 = scmp.ne.s32.totalorder %s781_s20, %s777_s19  ;;  %p49_p4 = scmp.eq.s32.totalorder %s793_s23, 0 }
  0x2e   : > { %s1094_s9 = smov (%p36_p1, %s34_s9), 0  ;;  %p1080_p8 = scmp.ne.s32.totalorder %s1074_s27, 0 }
  0x2f   : > { %p923_p6 = por %p49_p4, %p48_p2  ;;  %s38_s8 = ssub.s32 %s789_s22, %s1094_s9 }
  0x30   : > { %p929_p10 = por %p1080_p8, %p48_p2  ;;  %p590_p12 = scmp.lt.s32.totalorder %s793_s23, 2 }
  0x31   : > { %p39_p11 = scmp.eq.s32.totalorder %s38_s8, 0  ;;  %s227_s7 = sand.u32 1, %s781_s20  }
  0x32   : > { %s533_s14 = sshll.u32 %s227_s7, 3  ;;  %s534_s16 = sshll.u32 %s789_s22, 7 }
  0x33   : > { %s938_s15 = scalar_select %p39_p11, %s781_s20, %s41_s11  }
  0x34   : > { %s944_s25 = scalar_lea.hbm %s1063_s0, %s534_s16  ;;  %s231_s27 = scalar_lea.vmem [#allocation2], %s533_s14 }
  0x35   : > { %s238_s6 = sshll.u32 %s231_s27, 4  ;;  %p950_p13 = pnand %p590_p12, %p923_p6  ;;  %s946_s6 = int_to_ptr.vmem [resolvable:$true] %s238_s6 }
  0x36   : > { %s228_s11 = scalar_lea.sflag [#allocation3], %s227_s7  ;;  %s677_s8 = scalar_lea.hbm %s944_s25, 128 }
  0x37   : > { %p678_p0 = scmp.ne.s32.totalorder %s944_s25, %s677_s8  ;;  %p679_p3 = pneg %p950_p13 }
  0x38   : > { %s682_s17 = scalar_lea.hbm %s1063_s0, 256  ;;  %p683_p9 = scmp.lt.u32.totalorder %s944_s25, %s1063_s0 }
  0x39   : > { %p680_p5 = pnand %p679_p3, %p678_p0  ;;  %p684_p1 = scmp.lt.u32.totalorder %s682_s17, %s677_s8 }
  0x3a   : > { %p686_p4 = scmp.lt.u32.totalorder %s677_s8, %s944_s25 }
  0x3b   : > { %p681_p7 = pneg %p680_p5  ;;  %p685_p2 = por %p684_p1, %p683_p9 }
  0x3d   : > { %p687_p6 = por %p686_p4, %p685_p2 }
  0x3f   : > { %p688_p8 = pnand %p687_p6, %p681_p7 }
  0x41   : > { %691 = shalt.err (!%p688_p8)
}
  0x42   : > { %s692_s7 = scalar_lea.vmem %s946_s6, 128  ;;  %s798_s27 = smov [#allocation2]  }
  0x43   : > { %p693_p12 = scmp.ne.s32.totalorder %s946_s6, %s692_s7  ;;  %s697_s14 = sshll.u32 %s798_s27, 4  ;;  %s698_s14 = int_to_ptr.vmem [resolvable:$false] %s697_s14 }
  0x44   : > { %s699_s16 = scalar_lea.vmem %s698_s14, 256  ;;  %p700_p5 = scmp.lt.s32.totalorder %s946_s6, %s698_s14 }
  0x45   : > { %p695_p11 = pnand %p693_p12, %p679_p3  ;;  %p701_p9 = scmp.lt.s32.totalorder %s699_s16, %s692_s7 }
  0x47   : > { %p696_p0 = pneg %p695_p11  ;;  %p702_p1 = por %p701_p9, %p700_p5 }
  0x49   : > { %p703_p2 = pnand %p702_p1, %p696_p0 }
  0x4b   : > { %706 = shalt.err (!%p703_p2)
}
  0x4c   : > { %584 = dma.hbm_to_vmem [thread:$0]  (!%p950_p13), %s944_s25, 128, %s946_s6, %s228_s11  }
  0x4d   : > { %p1083_p7 = scmp.ne.s32.totalorder %s1077_s30, 0 }
  0x4e   : > { %s982_s8 = sand.u32 (!%p1083_p7), 1, %s777_s19   ;;  %p1084_p3 = scmp.ne.s32.totalorder (!%p1083_p7), %s1075_s28, 0 }
  0x4f   : > { %247 = sbr.rel (%p1083_p7) target bundleno = 491 (0x1eb), region = 40  ;;  %s536_s17 = sshll.u32 (!%p1083_p7), %s982_s8, 3 }
  0x50   : > { %s250_s12 = scalar_lea.sflag (!%p1083_p7), [#allocation3], %s982_s8  ;;  %s253_s24 = scalar_lea.vmem (!%p1083_p7), [#allocation2], %s536_s17 }
  0x56   : > { %760 = dma.done.wait (%p1084_p3), %s250_s12, 128  }
  0x57   : > { %762 = vsyncadd (%p1084_p3), %s250_s12, 4294967168  ;;  %p1085_p13 = scmp.ne.s32.totalorder %s1073_s26, 0 }
  0x59   : > { %764 = dma.done.wait (%p1085_p13), [#allocation6], 512  }
  0x5a   : > { %766 = vsyncadd (%p1085_p13), [#allocation6], 4294966784  ;;  %vm291_vm0 = vcmask 261120   ;;  %v290_v0 = vld [vmem:[%s253_s24] sm:$0xff]  ;;  %v324_v4 = vld [vmem:[#allocation5] sm:$0xff]  ;;  %v799_v7 = vmov 0.0|0.0  }
  0x5b   : > { %v292_v1 = vsel %vm291_vm0, %v290_v0, 0.0  ;;  %v296_v2 = vmul.f32 %v290_v0, %v290_v0  ;;  %v325_v5 = vld [vmem:[#allocation5 + $0x8] sm:$0xff]  ;;  %v326_v6 = vld [vmem:[#allocation5 + $0x10] sm:$0xff]  ;;  %563 = vmatprep.subr.bf16.mxu0 %v799_v7  ;;  %v327_v9 = vld [vmem:[#allocation5 + $0x18] sm:$0xff]  ;;  %vm800_vm1 = vmmov 0   ;;  %v801_v10 = vmov 0.0  }
  0x5c   : > { %293 = vadd.xlane.f32.xlu0 %v292_v1  ;;  %v564_v8 = vpack.c.bf16 %v325_v5, %v324_v4  ;;  %560 = vmatprep.mubr.msk.f32.mxu0 %vm800_vm1, %v801_v10  ;;  %v567_v11 = vpack.c.bf16 %v327_v9, %v326_v6  ;;  %v539_v22 = vld [vmem:[%s1064_s1] ss:$0 sm:$0xff]  ;;  %s544_s11 = sshll.u32 %s785_s21, 7  ;;  %s286_s7 = scalar_lea.vmem [#allocation7], %s536_s17 }
  0x5d   : > { %v297_v3 = vsel %vm291_vm0, %v296_v2, 0.0  ;;  %v540_v24 = vld [vmem:[%s1065_s2] ss:$0 sm:$0xff]  ;;  %s424_s27 = sshll.u32 %s286_s7, 4  ;;  %s1014_s12 = scalar_lea.hbm %s1068_s5, %s544_s11  ;;  %s1016_s27 = int_to_ptr.vmem [resolvable:$true] %s424_s27 }
  0x5e   : > { %565 = vmatpush3.bf16.msra.mxu0 %v564_v8  ;;  %v541_v27 = vld [vmem:[%s1067_s4] ss:$0 sm:$0xff]  ;;  %s410_s24 = scalar_lea.sflag [#allocation4], %s982_s8  ;;  %s707_s26 = scalar_lea.vmem %s1016_s27, 128 }
  0x5f   : > { %566 = vmatprep.subr.bf16.mxu0 %v799_v7  ;;  %p708_p4 = scmp.ne.s32.totalorder %s1016_s27, %s707_s26  ;;  %s802_s21 = smov [#allocation7]  }
  0x60   : > { %298 = vadd.xlane.f32.xlu0 %v297_v3  ;;  %s711_s17 = sshll.u32 %s802_s21, 4  ;;  %s712_s17 = int_to_ptr.vmem [resolvable:$false] %s711_s17 }
  0x61   : > { %p709_p6 = pnand %p708_p4, %p929_p10  ;;  %s713_s28 = scalar_lea.vmem %s712_s17, 256 }
  0x62   : > { %568 = vmatpush3.bf16.msra.mxu0 %v567_v11  ;;  %p714_p12 = scmp.lt.s32.totalorder %s1016_s27, %s712_s17  ;;  %p715_p11 = scmp.lt.s32.totalorder %s713_s28, %s707_s26 }
  0x63   : > { %p710_p8 = pneg %p709_p6 }
  0x64   : > { %p716_p0 = por %p715_p11, %p714_p12 }
  0x66   : > { %p717_p5 = pnand %p716_p0, %p710_p8 }
  0xe9   : > { %v294_v12 = vpop.xlane.xlu0 %293 }
  0xea   : > { %v295_v13 = vmul.f32 0.03125, %v294_v12 }
  0xec   : > { %v301_v15 = vmul.f32 %v295_v13, %v295_v13  ;;  %v306_v20 = vsub.f32 %v290_v0, %v295_v13 }
  0xed   : > { %v299_v14 = vpop.xlane.xlu0 %298 }
  0xee   : > { %v300_v16 = vmul.f32 0.03125, %v299_v14 }
  0xf0   : > { %v302_v17 = vsub.f32 %v300_v16, %v301_v15 }
  0xf2   : > { %v303_v18 = vmax.f32 %v302_v17, 0.0 }
  0xf4   : > { %v304_v19 = vadd.f32 1e-05, %v303_v18 }
  0xf6   : > { %647 = vrsqrt.f32 %v304_v19 }
 0x100   : > { %v648_v21 = vpop.eup %647 }
 0x101   : > { %v307_v23 = vmul.f32 %v648_v21, %v306_v20 }
 0x103   : > { %v315_v25 = vmul.f32 %v539_v22, %v307_v23 }
 0x105   : > { %v323_v26 = vadd.f32 %v540_v24, %v315_v25 }
 0x107   : > { %561 = vmatmul.mubr.msk.f32.vlgmr.msra.gmra.mrb[0].mxu0 %vm291_vm0, %v323_v26 }
 0x1da   : > { %v404_v28 = vpop.f32.mrb[0].mxu0 }
 0x1db   : > { %v405_v29 = vadd.f32 %v541_v27, %v404_v28  ;;  %v562_v30 = vpop.f32.mrb[1].mxu0 }
 0x1dd   : > { %408 = vst [vmem:[%s286_s7] sm:$0xff] %v405_v29 }
 0x1de   : > { %720 = shalt.err (!%p717_p5)
}
 0x1df   : > { %s721_s8 = scalar_lea.hbm %s1014_s12, 128  ;;  %s725_s6 = scalar_lea.hbm %s1068_s5, 256 }
 0x1e0   : > { %p722_p9 = scmp.ne.s32.totalorder %s1014_s12, %s721_s8  ;;  %p726_p7 = scmp.lt.u32.totalorder %s1014_s12, %s1068_s5 }
 0x1e1   : > { %p727_p3 = scmp.lt.u32.totalorder %s725_s6, %s721_s8  ;;  %p729_p4 = scmp.lt.u32.totalorder %s721_s8, %s1014_s12 }
 0x1e2   : > { %p723_p1 = pnand %p722_p9, %p929_p10 }
 0x1e3   : > { %p728_p13 = por %p727_p3, %p726_p7 }
 0x1e4   : > { %p724_p2 = pneg %p723_p1 }
 0x1e5   : > { %p730_p6 = por %p729_p4, %p728_p13 }
 0x1e7   : > { %p731_p8 = pnand %p730_p6, %p724_p2 }
 0x1e9   : > { %734 = shalt.err (!%p731_p8)
}
 0x1ea   : > { %575 = dma.vmem_to_hbm [thread:$0]  (%p929_p10), %s1016_s27, 128, %s1014_s12, %s410_s24  }
 0x1eb PF: > { %s436_s7 = sand.u32 1, %s773_s18   ;;  %p1086_p12 = scmp.ne.s32.totalorder %s1076_s29, 0 }
 0x1ec   : > { %p1087_p11 = scmp.ge.s32.totalorder %s793_s23, 2  ;;  %s437_s14 = scalar_lea.sflag [#allocation4], %s436_s7 }
 0x1ee   : > { %p586_p0 = pnand %p1087_p11, %p1086_p12 }
 0x1f0   : > { %768 = dma.done.wait (!%p586_p0), %s437_s14, 128  }
 0x1f1   : > { %770 = vsyncadd (!%p586_p0), %s437_s14, 4294967168  ;;  %s22_s23 = sadd.s32 1, %s793_s23   ;;  %s1088_s18 = smov %s777_s19 }
 0x1f2   : > { %p19_p5 = scmp.ge.s32.totalorder %s22_s23, 4   ;;  %s1089_s19 = smov %s781_s20 }
 0x1f3   : > { %s1090_s20 = smov %s938_s15  ;;  %s1091_s21 = smov %s789_s22 }
 0x1f4   : > { %s1092_s22 = smov %s1094_s9  ;;  %21 = sbr.rel (!%p19_p5) target bundleno = 7 (0x7), region = 93 }
 0x1fb   :  { %442 = vsyncpa [#allocation3], 1 }
 0x1fc   :  { %444 = vsyncpa [#allocation3 + $0x1], 1 }
 0x1fd   :  { %445 = vsyncpa [#allocation6], 1 }
 0x1fe   :  { %446 = vsyncpa [#allocation4], 1 }
 0x1ff   :  { %448 = vsyncpa [#allocation4 + $0x1], 1 }

</bundles_post_ra>
